<compile_context>
chip_gen: v5e
topology: v5e:2x2
jax: 0.10.0
libtpu: 0.0.40
codegen_flags: <defaults>
</compile_context>

<pallas_src>
import jax
import jax.numpy as jnp
from jax.experimental import pallas as pl
from jax.experimental.pallas import tpu as pltpu

_LANE = 128
_SUBLANE = 8


def _bias_add_kernel(x_ref, b_ref, o_ref):
    # x_ref: (tm, hw_blk) tile of the (N*C, H*W) view of the NCHW input
    # b_ref: (tm, 1) per-row (== per-channel) bias, f32
    # o_ref: (tm, hw_blk) output tile
    x = x_ref[...].astype(jnp.float32)
    b = b_ref[...].astype(jnp.float32)          # broadcast over the lane axis
    o_ref[...] = (x + b).astype(o_ref.dtype)


def _round_down(x: int, m: int) -> int:
    return (x // m) * m


def learnable_bias_forward(x_nchw: jax.Array, bias_1c11: jax.Array,
                           *, target_block_bytes: int = 2 << 20) -> jax.Array:
    """Equivalent of LearnableBias.forward: out = x + bias.expand_as(x).

    x_nchw:    (N, C, H, W)
    bias_1c11: (1, C, 1, 1)  (the nn.Parameter, kept in its own dtype)
    returns:   (N, C, H, W), same dtype as x.
    """
    N, C, H, W = x_nchw.shape
    assert bias_1c11.shape == (1, C, 1, 1)

    M, HW = N * C, H * W
    itemsize = jnp.dtype(x_nchw.dtype).itemsize

    # Free view of NCHW: rows are (n, c) pairs, lanes are the spatial axis.
    x2 = x_nchw.reshape(M, HW)
    # Tiny (M, 1) per-row bias table in f32 (C*N*4 bytes; negligible).
    b_rows = jnp.broadcast_to(
        bias_1c11.reshape(1, C).astype(jnp.float32), (N, C)).reshape(M, 1)

    # ---- tile sizing: ~target_block_bytes per block, lane-dense last dim ----
    row_bytes = HW * itemsize
    if row_bytes <= target_block_bytes:
        hw_blk = HW                                   # full lane axis (always legal)
        tm = target_block_bytes // row_bytes
        if tm >= M:
            tm = M                                    # whole tensor <= ~2 MiB: one block
        else:
            tm = max(_SUBLANE, _round_down(tm, _SUBLANE))
    else:
        # A single spatial row already exceeds the budget: tile the lane axis.
        tm = M if M < _SUBLANE else _SUBLANE
        hw_blk = max(_LANE,
                     _round_down(target_block_bytes // (tm * itemsize), _LANE))
        hw_blk = min(hw_blk, _round_down(HW, _LANE))

    grid = (pl.cdiv(M, tm), pl.cdiv(HW, hw_blk))      # masked partial edge tiles

    out2 = pl.pallas_call(
        _bias_add_kernel,
        out_shape=jax.ShapeDtypeStruct((M, HW), x_nchw.dtype),
        grid_spec=pltpu.PrefetchScalarGridSpec(
            num_scalar_prefetch=0,
            grid=grid,
            in_specs=[
                pl.BlockSpec((tm, hw_blk), lambda i, s: (i, s)),   # input rows
                pl.BlockSpec((tm, 1), lambda i, s: (i, 0)),        # matching bias rows
            ],
            out_specs=pl.BlockSpec((tm, hw_blk), lambda i, s: (i, s)),
        ),
        compiler_params=pltpu.CompilerParams(
            dimension_semantics=("parallel", "parallel")),
    )(x2, b_rows)

    # Free view back to NCHW.
    return out2.reshape(N, C, H, W)


if __name__ == "__main__":
    key = jax.random.PRNGKey(0)
    kx, kb = jax.random.split(key)

    N, C, H, W = 2, 4, 16, 16
    x = jax.random.normal(kx, (N, C, H, W), dtype=jnp.float32)

    # Parameter shape per LearnableBias.__init__: (1, out_chn, 1, 1).
    # (The module inits it to zeros; we use non-zero values so the
    #  broadcast-add is actually exercised.)
    bias = jax.random.normal(kb, (1, C, 1, 1), dtype=jnp.float32)

    out = learnable_bias_forward(x, bias)
    out = jax.block_until_ready(out)

    # Reference: plain JAX broadcast, mirrors x + bias.expand_as(x).
    ref = x + bias
    assert out.shape == x.shape and out.dtype == x.dtype
    assert jnp.allclose(out, ref, atol=1e-6, rtol=1e-6)

    print("KERNEL_OK")
</pallas_src>

<mosaic_0001>
module attributes {stable_mosaic.version = 11 : i64} {
  func.func @_bias_add_kernel(%arg0: i32, %arg1: i32, %arg2: memref<8x256xf32, #tpu.memory_space<vmem>>, %arg3: memref<8x1xf32, #tpu.memory_space<vmem>>, %arg4: memref<8x256xf32, #tpu.memory_space<vmem>>) attributes {dimension_semantics = [#tpu.dimension_semantics<parallel>, #tpu.dimension_semantics<parallel>], iteration_bounds = array<i64: 1, 1>, scalar_prefetch = 0 : i64, scratch_operands = 0 : i64, tpu.core_type = #tpu.core_type<tc>, window_params = [{transform_indices = @transform_0, window_bounds = array<i64: 8, 256>}, {transform_indices = @transform_1, window_bounds = array<i64: 8, 1>}, {transform_indices = @transform_2, window_bounds = array<i64: 8, 256>}]} {
    %c0 = arith.constant 0 : index
    %c0_0 = arith.constant 0 : index
    %0 = vector.load %arg2[%c0, %c0_0] : memref<8x256xf32, #tpu.memory_space<vmem>>, vector<8x256xf32>
    %c0_1 = arith.constant 0 : index
    %c0_2 = arith.constant 0 : index
    %1 = vector.load %arg3[%c0_1, %c0_2] : memref<8x1xf32, #tpu.memory_space<vmem>>, vector<8x1xf32>
    %2 = vector.broadcast %1 : vector<8x1xf32> to vector<8x256xf32>
    %3 = arith.addf %0, %2 : vector<8x256xf32>
    %c0_3 = arith.constant 0 : index
    %c0_4 = arith.constant 0 : index
    %4 = vector.load %arg4[%c0_3, %c0_4] : memref<8x256xf32, #tpu.memory_space<vmem>>, vector<8x256xf32>
    tpu.vector_store %arg4[%c0_3, %c0_4], %3 {strides = array<i32>} : memref<8x256xf32, #tpu.memory_space<vmem>>, vector<8x256xf32>,
    return
  }
  func.func @transform_0(%arg0: i32, %arg1: i32) -> (i32, i32) {
    %c0_i32 = arith.constant 0 : i32
    return %arg0, %arg1 : i32, i32
  }
  func.func @transform_1(%arg0: i32, %arg1: i32) -> (i32, i32) {
    %c0_i32 = arith.constant 0 : i32
    %c0_i32_0 = arith.constant 0 : i32
    return %arg0, %c0_i32 : i32, i32
  }
  func.func @transform_2(%arg0: i32, %arg1: i32) -> (i32, i32) {
    %c0_i32 = arith.constant 0 : i32
    return %arg0, %arg1 : i32, i32
  }
}

</mosaic_0001>

<bundles_post_ra>
// kernel: tpu_custom_call.1
= control target key start
LH: loop header
LB: loop body
LE: loop exit
PB: predicated region body
PF: predicated region fallthrough
CT: control target
= control target key end

     0   :  { %7 = vsyncpa [#allocation3], 0  ;;  %s138_s0 = inlined_call_operand.hbm [shape: f32[8,256], index: 0, kind: input, shape index: {}]   ;;  %s139_s1 = inlined_call_operand.vmem [shape: f32[8,1], index: 1, kind: input, shape index: {}]   ;;  %s140_s2 = inlined_call_operand.hbm [shape: f32[8,256], index: 2, kind: output, shape index: {}]  }
   0x1   :  { %8 = vsyncpa [#allocation4], 0  ;;  %s14_s11 = sshll.u32 %s138_s0, 4  ;;  %s111_s12 = smov [#allocation2]   ;;  %s15_s11 = int_to_ptr.hbm [resolvable:$true] %s14_s11 }
   0x2   :  { %s16_s13 = sshll.u32 %s111_s12, 4  ;;  %s17_s13 = int_to_ptr.vmem [resolvable:$true] %s16_s13 }
   0x3   :  { %19 = dma.hbm_to_vmem [thread:$0]  %s15_s11, 256, %s17_s13, [#allocation3]  }
   0x4   :  { %107 = dma.done.wait [#allocation3], 256  }
   0x5   :  { %108 = vsyncadd [#allocation3], 4294967040  ;;  %v112_v0 = vmov 0   ;;  %v28_v1 = vld [vmem:[%s139_s1] sm:$0xff]  ;;  %v27_v3 = vld [vmem:[#allocation2 + $0x8] sm:$0xff]  ;;  %s113_s16 = smov [#allocation5]  }
   0x6   :  { %58 = vset.pattern.permute.xlu0 %v112_v0  ;;  %v26_v2 = vld [vmem:[#allocation2] sm:$0xff]  ;;  %s43_s17 = sshll.u32 %s113_s16, 4  ;;  %s45_s19 = sshll.u32 %s140_s2, 4  ;;  %s44_s17 = int_to_ptr.vmem [resolvable:$true] %s43_s17  ;;  %s46_s19 = int_to_ptr.hbm [resolvable:$true] %s45_s19 }
   0x7   :  { %31 = vperm.xlu0 %58, %v28_v1  }
  0x79   :  { %v32_v4 = vpop.permute.xlu0 %31 }
  0x7a   :  { %v34_v5 = vadd.f32 %v32_v4, %v26_v2  ;;  %v35_v6 = vadd.f32 %v32_v4, %v27_v3 }
  0x7c   :  { %36 = vst [vmem:[#allocation5] sm:$0xff] %v34_v5 }
  0x7d   :  { %37 = vst [vmem:[#allocation5 + $0x8] sm:$0xff] %v35_v6 }
  0x7e   :  { %48 = dma.vmem_to_hbm [thread:$0]  %s44_s17, 256, %s46_s19, [#allocation4]  }
  0x7f   :  { %109 = dma.done.wait [#allocation4], 256  }
  0x80   :  { %110 = vsyncadd [#allocation4], 4294967040 }
  0x81   :  { %53 = vsyncpa [#allocation3], 1 }
  0x82   :  { %54 = vsyncpa [#allocation4], 1 }

</bundles_post_ra>
